<compile_context>
chip_gen: v5e
topology: v5e:2x2
jax: 0.10.0
libtpu: 0.0.40
codegen_flags: <defaults>
</compile_context>

<pallas_src>
import numpy as np
import jax
import jax.numpy as jnp
from jax.experimental import pallas as pl
from jax.experimental.pallas import tpu as pltpu

# --- config (cfg.feature_space equivalent) ---
FEATURE_SPACE = 32          # cfg.feature_space
OUT_DIM       = 2           # final output width of the decoder
HID           = 128         # first hidden width
LANES         = 128         # lane width used for the hidden layers
OUT_PAD       = 8           # lane width of the kernel output (wrapper slices [:, :2])

# Packed parameter slab layout (rows x 128 lanes), every segment 8-row aligned:
ROW_W1   = 0                          # (F, 128)   Linear1 weight^T
ROW_W2   = FEATURE_SPACE              # (128, 128) Linear2 weight^T, cols 2..127 zero
ROW_B1   = FEATURE_SPACE + 128        # (1, 128)   Linear1 bias
ROW_B2   = FEATURE_SPACE + 136        # (1, 128)   Linear2 bias (cols 2..127 zero)
ROW_B3   = FEATURE_SPACE + 144        # (1, 128)   Linear3 bias in lanes 0..1
ROW_W3C0 = FEATURE_SPACE + 152        # (1, 128)   W3[:, 0] in lanes 0..1 (coeff of h2[:,0])
ROW_W3C1 = FEATURE_SPACE + 160        # (1, 128)   W3[:, 1] in lanes 0..1 (coeff of h2[:,1])
PARAM_ROWS = FEATURE_SPACE + 168      # = 200 rows -> ~100 KiB f32 slab


def _flow_decoder_kernel(x_ref, p_ref, o_ref):
    """One batch tile: y = W3 @ tanh(W2 @ relu(W1 @ x + b1) + b2) + b3.

    x_ref : (TB, F)              input tile
    p_ref : (PARAM_ROWS, 128)    packed parameter slab (layout above)
    o_ref : (TB, OUT_PAD)        output tile, lanes 0..1 meaningful
    """
    F = FEATURE_SPACE
    x = x_ref[...]

    w1 = p_ref[ROW_W1:ROW_W1 + F, :]                 # (F, 128)
    w2 = p_ref[ROW_W2:ROW_W2 + HID, :]               # (128, 128) zero-padded cols >= 2
    b1 = p_ref[ROW_B1:ROW_B1 + 1, :]                 # (1, 128)
    b2 = p_ref[ROW_B2:ROW_B2 + 1, :]                 # (1, 128)   zero-padded
    b3 = p_ref[ROW_B3:ROW_B3 + 1, 0:OUT_PAD]         # (1, 8)
    c0 = p_ref[ROW_W3C0:ROW_W3C0 + 1, 0:OUT_PAD]     # (1, 8)  W3[j, 0] in lane j
    c1 = p_ref[ROW_W3C1:ROW_W3C1 + 1, 0:OUT_PAD]     # (1, 8)  W3[j, 1] in lane j

    # Layer 1: (TB, F) @ (F, 128) + bias, ReLU  (MXU + VPU)
    h1 = jnp.maximum(
        jnp.dot(x, w1, preferred_element_type=jnp.float32) + b1, 0.0)

    # Layer 2: padded cols of (h1 @ w2 + b2) are exactly 0 and tanh(0) = 0,
    # so the 128-lane padding stays numerically exact.  (MXU + EUP)
    h2 = jnp.tanh(
        jnp.dot(h1, w2, preferred_element_type=jnp.float32) + b2)

    # Layer 3 (Linear(2, 2)) entirely off the MXU — VPU epilogue:
    #   out[:, j] = h2[:, 0] * W3[j, 0] + h2[:, 1] * W3[j, 1] + b3[j]
    # Lanes 2..7 of `out` are exactly 0 (c0/c1/b3 are zero there).
    h2_0 = h2[:, 0:1]                                # (TB, 1)
    h2_1 = h2[:, 1:2]                                # (TB, 1)
    out = h2_0 * c0 + h2_1 * c1 + b3                 # (TB, 8)
    o_ref[...] = out.astype(o_ref.dtype)


def _round_up(x, m):
    return (x + m - 1) // m * m


def _cdiv(a, b):
    return -(-a // b)


def flow_decoder_forward(x, packed_params):
    """x: (B, feature_space) f32 -> (B, 2) f32."""
    B, F = x.shape
    assert F == FEATURE_SPACE

    # Batch tiling:
    #   * B <= 256        -> one block (fixed call overhead dominates anyway).
    #   * 256 < B <= 2048 -> exactly 2 tiles so both TCs are busy on v7x.
    #   * B > 2048        -> 1024-row tiles (per-step overhead << per-tile compute).
    MAX_TB = 1024
    if B <= 256:
        TB = _round_up(max(B, 8), 8)
    else:
        TB = min(MAX_TB, _round_up(_cdiv(B, 2), 8))
    Bp = _round_up(B, TB)
    if Bp != B:
        x = jnp.pad(x, ((0, Bp - B), (0, 0)))
    grid = (Bp // TB,)

    # Honest (lane-padded, executed-work) cost hint for XLA's scheduler.
    cost = pl.CostEstimate(
        flops=2 * Bp * (F * HID + HID * HID) + 6 * Bp * OUT_PAD,
        transcendentals=Bp * HID,                     # tanh runs on all 128 lanes
        bytes_accessed=Bp * F * 4 + PARAM_ROWS * LANES * 4 + Bp * OUT_PAD * 4,
    )

    out_padded = pl.pallas_call(
        _flow_decoder_kernel,
        out_shape=jax.ShapeDtypeStruct((Bp, OUT_PAD), jnp.float32),
        grid_spec=pltpu.PrefetchScalarGridSpec(
            num_scalar_prefetch=0,
            grid=grid,
            in_specs=[
                pl.BlockSpec((TB, F), lambda i: (i, 0)),
                pl.BlockSpec((PARAM_ROWS, LANES), lambda i: (0, 0)),
            ],
            out_specs=pl.BlockSpec((TB, OUT_PAD), lambda i: (i, 0)),
        ),
        compiler_params=pltpu.CompilerParams(
            dimension_semantics=("parallel",)),
        cost_estimate=cost,
    )(x, packed_params)

    return out_padded[:B, :OUT_DIM]


def init_params(key):
    """PyTorch-shaped weights (uniform +-1/sqrt(fan_in)) and the packed slab."""
    ks = jax.random.split(key, 6)
    F, H, O = FEATURE_SPACE, HID, OUT_DIM
    u = lambda k, shape, s: jax.random.uniform(k, shape, jnp.float32, -s, s)

    w1 = u(ks[0], (H, F), 1.0 / np.sqrt(F))   # Linear(feature_space, 128).weight
    b1 = u(ks[1], (H,),   1.0 / np.sqrt(F))
    w2 = u(ks[2], (O, H), 1.0 / np.sqrt(H))   # Linear(128, 2).weight
    b2 = u(ks[3], (O,),   1.0 / np.sqrt(H))
    w3 = u(ks[4], (O, O), 1.0 / np.sqrt(O))   # Linear(2, 2).weight
    b3 = u(ks[5], (O,),   1.0 / np.sqrt(O))

    raw = {"w1": w1, "b1": b1, "w2": w2, "b2": b2, "w3": w3, "b3": b3}

    slab = jnp.zeros((PARAM_ROWS, LANES), jnp.float32)
    slab = slab.at[ROW_W1:ROW_W1 + F, :].set(w1.T)            # (F, 128)
    slab = slab.at[ROW_W2:ROW_W2 + H, 0:O].set(w2.T)          # (128, 2) into 128 lanes
    slab = slab.at[ROW_B1, :].set(b1)
    slab = slab.at[ROW_B2, 0:O].set(b2)
    slab = slab.at[ROW_B3, 0:O].set(b3)
    slab = slab.at[ROW_W3C0, 0:O].set(w3[:, 0])               # coeff multiplying h2[:, 0]
    slab = slab.at[ROW_W3C1, 0:O].set(w3[:, 1])               # coeff multiplying h2[:, 1]
    return raw, slab


def _reference(x, w):
    """Pure-JAX reference of the PyTorch module."""
    h1 = jnp.maximum(x @ w["w1"].T + w["b1"], 0.0)
    h2 = jnp.tanh(h1 @ w["w2"].T + w["b2"])
    return h2 @ w["w3"].T + w["b3"]


if __name__ == "__main__":
    key = jax.random.PRNGKey(0)
    k_x, k_p, k_x2 = jax.random.split(key, 3)

    raw_params, packed_params = init_params(k_p)

    # Small-batch, single-tile path.
    B = 8
    x = jax.random.normal(k_x, (B, FEATURE_SPACE), jnp.float32)
    out = jax.block_until_ready(flow_decoder_forward(x, packed_params))
    ref = _reference(x, raw_params)
    assert out.shape == (B, OUT_DIM)
    np.testing.assert_allclose(np.asarray(out), np.asarray(ref),
                               rtol=1e-5, atol=1e-5)

    # Multi-tile (grid=2) path with batch padding.
    B2 = 300
    x2 = jax.random.normal(k_x2, (B2, FEATURE_SPACE), jnp.float32)
    out2 = jax.block_until_ready(flow_decoder_forward(x2, packed_params))
    ref2 = _reference(x2, raw_params)
    assert out2.shape == (B2, OUT_DIM)
    np.testing.assert_allclose(np.asarray(out2), np.asarray(ref2),
                               rtol=1e-5, atol=1e-5)

    print("KERNEL_OK")
</pallas_src>

<mosaic_0001>
module attributes {stable_mosaic.version = 11 : i64} {
  func.func @_flow_decoder_kernel(%arg0: i32, %arg1: memref<8x32xf32, #tpu.memory_space<vmem>>, %arg2: memref<200x128xf32, #tpu.memory_space<vmem>>, %arg3: memref<8x8xf32, #tpu.memory_space<vmem>>) attributes {dimension_semantics = [#tpu.dimension_semantics<parallel>], iteration_bounds = array<i64: 1>, scalar_prefetch = 0 : i64, scratch_operands = 0 : i64, tpu.core_type = #tpu.core_type<tc>, window_params = [{transform_indices = @transform_0, window_bounds = array<i64: 8, 32>}, {pipeline_mode = #tpu.pipeline_mode<synchronous>, transform_indices = @transform_1, window_bounds = array<i64: 200, 128>}, {transform_indices = @transform_2, window_bounds = array<i64: 8, 8>}]} {
    %c0 = arith.constant 0 : index
    %c0_0 = arith.constant 0 : index
    %0 = vector.load %arg1[%c0, %c0_0] : memref<8x32xf32, #tpu.memory_space<vmem>>, vector<8x32xf32>
    %c0_1 = arith.constant 0 : index
    %c0_2 = arith.constant 0 : index
    %1 = vector.load %arg2[%c0_1, %c0_2] : memref<200x128xf32, #tpu.memory_space<vmem>>, vector<32x128xf32>
    %c32 = arith.constant 32 : index
    %c0_3 = arith.constant 0 : index
    %2 = vector.load %arg2[%c32, %c0_3] : memref<200x128xf32, #tpu.memory_space<vmem>>, vector<128x128xf32>
    %c160 = arith.constant 160 : index
    %c0_4 = arith.constant 0 : index
    %3 = vector.load %arg2[%c160, %c0_4] : memref<200x128xf32, #tpu.memory_space<vmem>>, vector<1x128xf32>
    %c168 = arith.constant 168 : index
    %c0_5 = arith.constant 0 : index
    %4 = vector.load %arg2[%c168, %c0_5] : memref<200x128xf32, #tpu.memory_space<vmem>>, vector<1x128xf32>
    %c176 = arith.constant 176 : index
    %c0_6 = arith.constant 0 : index
    %5 = vector.load %arg2[%c176, %c0_6] : memref<200x128xf32, #tpu.memory_space<vmem>>, vector<1x8xf32>
    %c184 = arith.constant 184 : index
    %c0_7 = arith.constant 0 : index
    %6 = vector.load %arg2[%c184, %c0_7] : memref<200x128xf32, #tpu.memory_space<vmem>>, vector<1x8xf32>
    %c192 = arith.constant 192 : index
    %c0_8 = arith.constant 0 : index
    %7 = vector.load %arg2[%c192, %c0_8] : memref<200x128xf32, #tpu.memory_space<vmem>>, vector<1x8xf32>
    %cst = arith.constant dense<0.000000e+00> : vector<8x128xf32>
    %8 = tpu.matmul %0, %1, %cst {dimension_numbers = #tpu.dot_dimension_numbers<[1], [0], [0], [1], [0, 0, 1, 1], [], []>} : vector<8x32xf32>, vector<32x128xf32>, vector<8x128xf32> -> vector<8x128xf32>
    %9 = vector.broadcast %3 : vector<1x128xf32> to vector<8x128xf32>
    %10 = arith.addf %8, %9 : vector<8x128xf32>
    %cst_9 = arith.constant 0.000000e+00 : f32
    %11 = vector.broadcast %cst_9 : f32 to vector<8x128xf32>
    %12 = arith.maximumf %10, %11 : vector<8x128xf32>
    %cst_10 = arith.constant dense<0.000000e+00> : vector<8x128xf32>
    %13 = tpu.matmul %12, %2, %cst_10 {dimension_numbers = #tpu.dot_dimension_numbers<[1], [0], [0], [1], [0, 0, 1, 1], [], []>} : vector<8x128xf32>, vector<128x128xf32>, vector<8x128xf32> -> vector<8x128xf32>
    %14 = vector.broadcast %4 : vector<1x128xf32> to vector<8x128xf32>
    %15 = arith.addf %13, %14 : vector<8x128xf32>
    %16 = math.tanh %15 : vector<8x128xf32>
    %17 = vector.extract_strided_slice %16 {offsets = [0, 0], sizes = [8, 1], strides = [1, 1]} : vector<8x128xf32> to vector<8x1xf32>
    %18 = vector.extract_strided_slice %16 {offsets = [0, 1], sizes = [8, 1], strides = [1, 1]} : vector<8x128xf32> to vector<8x1xf32>
    %19 = vector.broadcast %17 : vector<8x1xf32> to vector<8x8xf32>
    %20 = vector.broadcast %6 : vector<1x8xf32> to vector<8x8xf32>
    %21 = arith.mulf %19, %20 : vector<8x8xf32>
    %22 = vector.broadcast %18 : vector<8x1xf32> to vector<8x8xf32>
    %23 = vector.broadcast %7 : vector<1x8xf32> to vector<8x8xf32>
    %24 = arith.mulf %22, %23 : vector<8x8xf32>
    %25 = arith.addf %21, %24 : vector<8x8xf32>
    %26 = vector.broadcast %5 : vector<1x8xf32> to vector<8x8xf32>
    %27 = arith.addf %25, %26 : vector<8x8xf32>
    %c0_11 = arith.constant 0 : index
    %c0_12 = arith.constant 0 : index
    %28 = vector.load %arg3[%c0_11, %c0_12] : memref<8x8xf32, #tpu.memory_space<vmem>>, vector<8x8xf32>
    tpu.vector_store %arg3[%c0_11, %c0_12], %27 {strides = array<i32>} : memref<8x8xf32, #tpu.memory_space<vmem>>, vector<8x8xf32>,
    return
  }
  func.func @transform_0(%arg0: i32) -> (i32, i32) {
    %c0_i32 = arith.constant 0 : i32
    %c0_i32_0 = arith.constant 0 : i32
    return %arg0, %c0_i32 : i32, i32
  }
  func.func @transform_1(%arg0: i32) -> (i32, i32) {
    %c0_i32 = arith.constant 0 : i32
    %c0_i32_0 = arith.constant 0 : i32
    %c0_i32_1 = arith.constant 0 : i32
    return %c0_i32, %c0_i32_0 : i32, i32
  }
  func.func @transform_2(%arg0: i32) -> (i32, i32) {
    %c0_i32 = arith.constant 0 : i32
    %c0_i32_0 = arith.constant 0 : i32
    return %arg0, %c0_i32 : i32, i32
  }
}

</mosaic_0001>

<bundles_post_ra>
// kernel: tpu_custom_call.1
= control target key start
LH: loop header
LB: loop body
LE: loop exit
PB: predicated region body
PF: predicated region fallthrough
CT: control target
= control target key end

     0   :  { %7 = vsyncpa [#allocation3], 0  ;;  %s278_s0 = inlined_call_operand.hbm [shape: f32[8,32], index: 0, kind: input, shape index: {}]   ;;  %s279_s1 = inlined_call_operand.hbm [shape: f32[200,128], index: 1, kind: input, shape index: {}]   ;;  %s280_s2 = inlined_call_operand.hbm [shape: f32[8,8], index: 2, kind: output, shape index: {}]  }
   0x1   :  { %8 = vsyncpa [#allocation6], 0 }
   0x2   :  { %9 = vsyncpa [#allocation4], 0  ;;  %s15_s11 = sshll.u32 %s278_s0, 4  ;;  %s247_s12 = smov [#allocation2]   ;;  %s16_s11 = int_to_ptr.hbm [resolvable:$true] %s15_s11 }
   0x3   :  { %s17_s13 = sshll.u32 %s247_s12, 4  ;;  %s25_s16 = sshll.u32 %s279_s1, 4  ;;  %s18_s13 = int_to_ptr.vmem [resolvable:$true] %s17_s13  ;;  %s26_s16 = int_to_ptr.hbm [resolvable:$true] %s25_s16 }
   0x4   :  { %20 = dma.hbm_to_vmem [thread:$0]  %s16_s11, 128, %s18_s13, [#allocation3]  }
   0x5   :  { %s248_s17 = smov [#allocation5]   ;;  %s249_s19 = smov 128  }
   0x6   :  { %s27_s18 = sshll.u32 %s248_s17, 4  ;;  %s250_s20 = smov 8   ;;  %s28_s18 = int_to_ptr.vmem [resolvable:$true] %s27_s18 }
   0x7   :  { %33 = dma.hbm_to_vmem [thread:$0]  %s26_s16, 3200, %s28_s18, [#allocation6], %s249_s19, %s249_s19, %s250_s20  }
   0x8   :  { %241 = dma.done.wait [#allocation3], 128  }
   0x9   :  { %242 = vsyncadd [#allocation3], 4294967168 }
   0xa   :  { %243 = dma.done.wait [#allocation6], 3200  }
   0xb   :  { %244 = vsyncadd [#allocation6], 4294964096  ;;  %v46_v0 = vld [vmem:[#allocation5 + $0x18] sm:$0xff]  ;;  %v45_v1 = vld [vmem:[#allocation5 + $0x10] sm:$0xff]  ;;  %vm69_vm0 = vcmask 261120   ;;  %v251_v25 = vmov 0  }
   0xc   :  { %85 = vmatpush.msra.mxu0 %v46_v0  ;;  %v62_v2 = vld [vmem:[#allocation5 + $0x98] sm:$0xff]  ;;  %v44_v3 = vld [vmem:[#allocation5 + $0x8] sm:$0xff]  ;;  %v61_v4 = vld [vmem:[#allocation5 + $0x90] sm:$0xff]  ;;  %160 = vset.pattern.permute.xlu0 %v251_v25  ;;  %v252_v30 = vmov 1   ;;  %s253_s0 = smov [#allocation7]   ;;  %s141_s23 = sshll.u32 %s280_s2, 4  ;;  %s142_s23 = int_to_ptr.hbm [resolvable:$true] %s141_s23 }
   0xd   :  { %95 = vmatpush.msra.mxu1 %v62_v2  ;;  %v60_v5 = vld [vmem:[#allocation5 + $0x88] sm:$0xff]  ;;  %v43_v6 = vld [vmem:[#allocation5] sm:$0xff]  ;;  %v42_v7 = vld [vmem:[#allocation2] sm:$0xff]  ;;  %s139_s1 = sshll.u32 %s253_s0, 4  ;;  %vm132_vm1 = vcmask 64512   ;;  %s140_s1 = int_to_ptr.vmem [resolvable:$true] %s139_s1 }
   0xe   :  { %86 = vmatpush.msra.mxu0 %v45_v1  ;;  %v59_v8 = vld [vmem:[#allocation5 + $0x80] sm:$0xff]  ;;  %v58_v9 = vld [vmem:[#allocation5 + $0x78] sm:$0xff]  ;;  %v57_v10 = vld [vmem:[#allocation5 + $0x70] sm:$0xff] }
   0xf   :  { %96 = vmatpush.msra.mxu1 %v61_v4  ;;  %v56_v11 = vld [vmem:[#allocation5 + $0x68] sm:$0xff]  ;;  %v55_v12 = vld [vmem:[#allocation5 + $0x60] sm:$0xff]  ;;  %v54_v13 = vld [vmem:[#allocation5 + $0x58] sm:$0xff] }
  0x10   :  { %87 = vmatpush.msra.mxu0 %v44_v3  ;;  %v53_v14 = vld [vmem:[#allocation5 + $0x50] sm:$0xff]  ;;  %v52_v15 = vld [vmem:[#allocation5 + $0x48] sm:$0xff]  ;;  %v51_v16 = vld [vmem:[#allocation5 + $0x40] sm:$0xff] }
  0x11   :  { %97 = vmatpush.msra.mxu1 %v60_v5  ;;  %v50_v17 = vld [vmem:[#allocation5 + $0x38] sm:$0xff]  ;;  %v49_v18 = vld [vmem:[#allocation5 + $0x30] sm:$0xff]  ;;  %v48_v19 = vld [vmem:[#allocation5 + $0x28] sm:$0xff] }
  0x12   :  { %88 = vmatpush.msra.mxu0 %v43_v6  ;;  %v47_v20 = vld [vmem:[#allocation5 + $0x20] sm:$0xff]  ;;  %v163_v26 = vld [vmem:[#allocation5 + $0xa8] ss:$0 sm:$0xff]  ;;  %v164_v32 = vld [vmem:[#allocation5 + $0xb8] ss:$0 sm:$0xff] }
  0x13   :  { %152 = vmatmul.msk.f32.vlgmr.msra.gmra.mxu0 %vm69_vm0, %v42_v7  ;;  %98 = vmatpush.msra.mxu1 %v59_v8  ;;  %v162_v21 = vld [vmem:[#allocation5 + $0xa0] ss:$0 sm:$0xff]  ;;  %v166_v36 = vld [vmem:[#allocation5 + $0xb0] ss:$0 sm:$0xff] }
  0x14   :  { %v165_v33 = vld [vmem:[#allocation5 + $0xc0] ss:$0 sm:$0xff] }
  0x15   :  { %99 = vmatpush.msra.mxu1 %v58_v9 }
  0x17   :  { %100 = vmatpush.msra.mxu1 %v57_v10 }
  0x19   :  { %101 = vmatpush.msra.mxu1 %v56_v11 }
  0x1b   :  { %102 = vmatpush.msra.mxu1 %v55_v12 }
  0x1d   :  { %103 = vmatpush.msra.mxu1 %v54_v13 }
  0x1f   :  { %104 = vmatpush.msra.mxu1 %v53_v14 }
  0x21   :  { %105 = vmatpush.msra.mxu1 %v52_v15 }
  0x23   :  { %106 = vmatpush.msra.mxu1 %v51_v16 }
  0x25   :  { %107 = vmatpush.msra.mxu1 %v50_v17 }
  0x27   :  { %108 = vmatpush.msra.mxu1 %v49_v18 }
  0x29   :  { %109 = vmatpush.msra.mxu1 %v48_v19 }
  0x2b   :  { %110 = vmatpush.msra.mxu1 %v47_v20 }
  0x90   :  { %v90_v22 = vpop.f32.mrf.mxu0 }
  0x91   :  { %v91_v23 = vadd.f32 %v162_v21, %v90_v22 }
  0x93   :  { %v93_v24 = vmax.f32 %v91_v23, 0.0 }
  0x95   :  { %111 = vmatmul.f32.vlgmr.msra.gmra.mxu1 %v93_v24 }
 0x112   :  { %v112_v27 = vpop.f32.mrf.mxu1 }
 0x113   :  { %v113_v28 = vadd.f32 %v163_v26, %v112_v27 }
 0x115   :  { %167 = vtanh.f32 %v113_v28 }
 0x11b   :  { %v168_v29 = vpop.eup %167 }
 0x11c   :  { %118 = vperm.xlu0 %160, %v168_v29  }
 0x124   :  { %161 = vset.pattern.permute.xlu0 %v252_v30 }
 0x125   :  { %124 = vperm.xlu0 %161, %v168_v29  }
 0x18e   :  { %v119_v31 = vpop.permute.xlu0 %118 }
 0x18f   :  { %v122_v35 = vmul.f32 %v164_v32, %v119_v31 }
 0x197   :  { %v125_v34 = vpop.permute.xlu0 %124 }
 0x198   :  { %v128_v37 = vmul.f32 %v165_v33, %v125_v34 }
 0x19a   :  { %v129_v38 = vadd.f32 %v128_v37, %v122_v35 }
 0x19c   :  { %v131_v39 = vadd.f32 %v166_v36, %v129_v38 }
 0x19e   :  { %133 = vst.msk [vmem:[#allocation7] sm:$0xff] %vm132_vm1, %v131_v39 }
 0x19f   :  { %144 = dma.vmem_to_hbm [thread:$0]  %s140_s1, 128, %s142_s23, [#allocation4]  }
 0x1a0   :  { %245 = dma.done.wait [#allocation4], 128  }
 0x1a1   :  { %246 = vsyncadd [#allocation4], 4294967168 }
 0x1a2   :  { %149 = vsyncpa [#allocation3], 1 }
 0x1a3   :  { %150 = vsyncpa [#allocation6], 1 }
 0x1a4   :  { %151 = vsyncpa [#allocation4], 1 }

</bundles_post_ra>
